<compile_context>
chip_gen: v5e
topology: v5e:2x2
jax: 0.10.0
libtpu: 0.0.40
codegen_flags: <defaults>
</compile_context>

<pallas_src>
import functools

import jax
import jax.numpy as jnp
from jax.experimental import pallas as pl
from jax.experimental.pallas import tpu as pltpu

GAMMA = 2.0
ALPHA = 0.25
LANES = 128


def _vfloss_kernel(pred_ref, true_ref, out_ref, acc_ref, *,
                   gamma, alpha, rows, tile_rows, n_tiles, n_half, need_mask):
    c = pl.program_id(0)              # 2-way megacore split (serial loop on 1-TC chips)
    i = pl.program_id(1)              # reduction axis
    blk = c * n_half + i              # logical tile id (may exceed n_tiles-1 when odd)

    @pl.when(i == 0)
    def _():
        acc_ref[...] = jnp.zeros_like(acc_ref)

    def accumulate(mask_rows):
        x = pred_ref[...].astype(jnp.float32)
        y = true_ref[...].astype(jnp.float32)

        # Shared exp(-|x|) feeds both the stable-BCE log term and the sigmoid.
        e = jnp.exp(-jnp.abs(x))
        bce = jnp.maximum(x, 0.0) - x * y + jnp.log1p(e)

        # sigmoid(x) = (x>=0 ? 1 : e) * 1/(1+e); approx reciprocal -> EUP slot.
        inv = pl.reciprocal(1.0 + e, approx=True)
        pred_prob = jnp.where(x >= 0.0, 1.0, e) * inv

        d = pred_prob - y
        if gamma == 2.0:
            dg = d * d                       # avoid lax.pow (exp/log on the EUP)
        else:
            dg = jnp.abs(d) ** gamma
        # Single select instead of pos/neg bool casts + two blends.
        fw = jnp.where(y > 0.0, y, alpha * dg)
        v = bce * fw

        if mask_rows:
            # Row-only validity check (input is lane-aligned); no multiply,
            # no int32 overflow for any realistic input size.
            row0 = blk * tile_rows
            r = jax.lax.broadcasted_iota(jnp.int32, v.shape, 0)
            v = jnp.where(row0 + r < rows, v, 0.0)

        # Collapse the tile onto one (8,128) vreg: pure VPU adds over the
        # vreg-stack axis; accumulator read-modify-write is a single vreg.
        acc_ref[...] += jnp.sum(v.reshape(tile_rows // 8, 8, LANES), axis=0)

    if need_mask:
        @pl.when(blk < n_tiles - 1)          # interior tiles: no mask work at all
        def _():
            accumulate(False)

        @pl.when(blk == n_tiles - 1)         # only the last real tile is masked
        def _():
            accumulate(True)
    elif 2 * n_half != n_tiles:
        @pl.when(blk < n_tiles)              # skip the duplicated clamped tile
        def _():
            accumulate(False)
    else:
        accumulate(False)                    # perfectly even: no gating needed

    @pl.when(i == pl.num_programs(1) - 1)
    def _():
        out_ref[...] = acc_ref[...]


def _vf_elem_jax(x, y, gamma, alpha):
    """Per-element VF-weighted BCE in pure JAX (used for the <128-elem tail)."""
    x = x.astype(jnp.float32)
    y = y.astype(jnp.float32)
    bce = jnp.maximum(x, 0.0) - x * y + jnp.log1p(jnp.exp(-jnp.abs(x)))
    p = jax.nn.sigmoid(x)
    fw = jnp.where(y > 0.0, y, alpha * jnp.abs(p - y) ** gamma)
    return bce * fw


def vf_loss(pred, true, gamma=GAMMA, alpha=ALPHA, tile_rows=2048):
    """VFLoss forward (BCEWithLogits, outer reduction='mean')."""
    assert pred.shape == true.shape
    total = pred.size

    pred_flat = pred.reshape(-1)
    true_flat = true.reshape(-1)

    # Kernel consumes the lane-aligned prefix; the (<128-element) tail is folded
    # in with a tiny pure-JAX sum -- no full-array jnp.pad copy in the wrapper.
    rem = total % LANES
    aligned = total - rem
    tail_sum = jnp.float32(0.0)
    if rem != 0:
        tail_sum = jnp.sum(
            _vf_elem_jax(pred_flat[aligned:], true_flat[aligned:], gamma, alpha))
        pred_flat = pred_flat[:aligned]
        true_flat = true_flat[:aligned]
    if aligned == 0:
        return tail_sum / jnp.float32(total)

    rows = aligned // LANES
    pred2d = pred_flat.reshape(rows, LANES)
    true2d = true_flat.reshape(rows, LANES)

    # tile_rows: multiple of 8, no larger than the sublane-rounded row count.
    rows8 = ((rows + 7) // 8) * 8
    tile_rows = max(8, min(int(tile_rows), rows8))
    tile_rows = ((tile_rows + 7) // 8) * 8

    n_tiles = pl.cdiv(rows, tile_rows)
    n_half = pl.cdiv(n_tiles, 2)            # tiles per parallel slice
    max_blk = n_tiles - 1
    need_mask = (rows % tile_rows) != 0

    def in_map(c, i):
        # Clamp so the DMA window always stays in bounds; the duplicated block on
        # the extra iteration is pl.when-skipped inside the kernel.
        return (jnp.minimum(c * n_half + i, max_blk), 0)

    kernel = functools.partial(
        _vfloss_kernel, gamma=gamma, alpha=alpha, rows=rows,
        tile_rows=tile_rows, n_tiles=n_tiles, n_half=n_half,
        need_mask=need_mask)

    bytes_in = (pred2d.size * pred2d.dtype.itemsize
                + true2d.size * true2d.dtype.itemsize)
    cost = pl.CostEstimate(flops=18 * aligned,
                           transcendentals=3 * aligned,
                           bytes_accessed=bytes_in + 16 * LANES * 4)

    partial_sums = pl.pallas_call(
        kernel,
        out_shape=jax.ShapeDtypeStruct((16, LANES), jnp.float32),
        grid_spec=pltpu.PrefetchScalarGridSpec(
            num_scalar_prefetch=0,
            grid=(2, n_half),
            in_specs=[
                pl.BlockSpec((tile_rows, LANES), in_map),
                pl.BlockSpec((tile_rows, LANES), in_map),
            ],
            out_specs=pl.BlockSpec((8, LANES), lambda c, i: (c, 0)),
            scratch_shapes=[pltpu.VMEM((8, LANES), jnp.float32)],
        ),
        compiler_params=pltpu.CompilerParams(
            dimension_semantics=("parallel", "arbitrary"),
        ),
        cost_estimate=cost,
    )(pred2d, true2d)

    # Tiny (16,128) final reduce + mean done by XLA.
    return (jnp.sum(partial_sums) + tail_sum) / jnp.float32(total)


def vf_loss_ref(pred, true, gamma=GAMMA, alpha=ALPHA):
    """Pure-JAX reference for correctness checking."""
    x = pred.astype(jnp.float32)
    y = true.astype(jnp.float32)
    bce = jnp.maximum(x, 0.0) - x * y + jnp.log1p(jnp.exp(-jnp.abs(x)))
    p = jax.nn.sigmoid(x)
    fw = y * (y > 0.0) + alpha * jnp.abs(p - y) ** gamma * (y <= 0.0)
    return jnp.mean(bce * fw)


if __name__ == "__main__":
    key = jax.random.PRNGKey(0)
    k1, k2 = jax.random.split(key)

    # Small detection-head-like shape: (N, C, H, W)
    N, C, H, W = 2, 4, 16, 16
    pred = jax.random.normal(k1, (N, C, H, W), dtype=jnp.float32) * 2.0
    raw = jax.random.uniform(k2, (N, C, H, W), dtype=jnp.float32)
    true = jnp.where(raw > 0.7, raw, 0.0)   # zeros (neg) + soft positives

    out = vf_loss(pred, true)
    out = jax.block_until_ready(out)

    ref = vf_loss_ref(pred, true)
    # rtol slightly looser than exact-divide version: sigmoid uses EUP approx
    # reciprocal (pl.reciprocal(approx=True)).
    assert jnp.allclose(out, ref, rtol=1e-3, atol=1e-6), (out, ref)

    print("KERNEL_OK")
</pallas_src>

<mosaic_0001>
module attributes {stable_mosaic.version = 11 : i64} {
  func.func @_vfloss_kernel(%arg0: i32, %arg1: i32, %arg2: memref<16x128xf32, #tpu.memory_space<vmem>>, %arg3: memref<16x128xf32, #tpu.memory_space<vmem>>, %arg4: memref<8x128xf32, #tpu.memory_space<vmem>>, %arg5: memref<8x128xf32, #tpu.memory_space<vmem>>) attributes {dimension_semantics = [#tpu.dimension_semantics<parallel>, #tpu.dimension_semantics<arbitrary>], iteration_bounds = array<i64: 2, 1>, scalar_prefetch = 0 : i64, scratch_operands = 1 : i64, tpu.core_type = #tpu.core_type<tc>, window_params = [{transform_indices = @transform_0, window_bounds = array<i64: 16, 128>}, {transform_indices = @transform_1, window_bounds = array<i64: 16, 128>}, {transform_indices = @transform_2, window_bounds = array<i64: 8, 128>}]} {
    %c1_i32 = arith.constant 1 : i32
    %0 = arith.muli %arg0, %c1_i32 : i32
    %1 = arith.addi %0, %arg1 : i32
    %c0_i32 = arith.constant 0 : i32
    %2 = arith.cmpi eq, %arg1, %c0_i32 : i32
    %3 = arith.extui %2 : i1 to i32
    %c0_i32_0 = arith.constant 0 : i32
    %4 = arith.cmpi ne, %3, %c0_i32_0 : i32
    scf.if %4 {
      %cst = arith.constant 0.000000e+00 : f32
      %11 = vector.broadcast %cst : f32 to vector<8x128xf32>
      %c0 = arith.constant 0 : index
      %c0_5 = arith.constant 0 : index
      %12 = vector.load %arg5[%c0, %c0_5] : memref<8x128xf32, #tpu.memory_space<vmem>>, vector<8x128xf32>
      tpu.vector_store %arg5[%c0, %c0_5], %11 {strides = array<i32>} : memref<8x128xf32, #tpu.memory_space<vmem>>, vector<8x128xf32>,
    } else {
    }
    %c1_i32_1 = arith.constant 1 : i32
    %5 = arith.cmpi slt, %1, %c1_i32_1 : i32
    %6 = arith.extui %5 : i1 to i32
    %c0_i32_2 = arith.constant 0 : i32
    %7 = arith.cmpi ne, %6, %c0_i32_2 : i32
    scf.if %7 {
      %c0 = arith.constant 0 : index
      %c0_5 = arith.constant 0 : index
      %11 = vector.load %arg2[%c0, %c0_5] : memref<16x128xf32, #tpu.memory_space<vmem>>, vector<16x128xf32>
      %c0_6 = arith.constant 0 : index
      %c0_7 = arith.constant 0 : index
      %12 = vector.load %arg3[%c0_6, %c0_7] : memref<16x128xf32, #tpu.memory_space<vmem>>, vector<16x128xf32>
      %13 = math.absf %11 : vector<16x128xf32>
      %cst = arith.constant 0.000000e+00 : f32
      %14 = vector.broadcast %cst : f32 to vector<16x128xf32>
      %15 = arith.subf %14, %13 : vector<16x128xf32>
      %16 = math.exp %15 : vector<16x128xf32>
      %cst_8 = arith.constant 0.000000e+00 : f32
      %17 = vector.broadcast %cst_8 : f32 to vector<16x128xf32>
      %18 = arith.maximumf %11, %17 : vector<16x128xf32>
      %19 = arith.mulf %11, %12 : vector<16x128xf32>
      %20 = arith.subf %18, %19 : vector<16x128xf32>
      %21 = math.log1p %16 : vector<16x128xf32>
      %22 = arith.addf %20, %21 : vector<16x128xf32>
      %cst_9 = arith.constant 1.000000e+00 : f32
      %23 = vector.broadcast %cst_9 : f32 to vector<16x128xf32>
      %24 = arith.addf %23, %16 : vector<16x128xf32>
      %25 = tpu.reciprocal %24 {approx = true} : vector<16x128xf32> -> vector<16x128xf32>
      %cst_10 = arith.constant 0.000000e+00 : f32
      %26 = vector.broadcast %cst_10 : f32 to vector<16x128xf32>
      %27 = arith.cmpf oge, %11, %26 : vector<16x128xf32>
      %cst_11 = arith.constant 1.000000e+00 : f32
      %28 = vector.broadcast %cst_11 : f32 to vector<16x128xf32>
      %29 = arith.select %27, %28, %16 : vector<16x128xi1>, vector<16x128xf32>
      %30 = arith.mulf %29, %25 : vector<16x128xf32>
      %31 = arith.subf %30, %12 : vector<16x128xf32>
      %32 = arith.mulf %31, %31 : vector<16x128xf32>
      %cst_12 = arith.constant 0.000000e+00 : f32
      %33 = vector.broadcast %cst_12 : f32 to vector<16x128xf32>
      %34 = arith.cmpf ogt, %12, %33 : vector<16x128xf32>
      %cst_13 = arith.constant 2.500000e-01 : f32
      %35 = vector.broadcast %cst_13 : f32 to vector<16x128xf32>
      %36 = arith.mulf %35, %32 : vector<16x128xf32>
      %37 = arith.select %34, %12, %36 : vector<16x128xi1>, vector<16x128xf32>
      %38 = arith.mulf %22, %37 : vector<16x128xf32>
      %c0_14 = arith.constant 0 : index
      %c0_15 = arith.constant 0 : index
      %39 = vector.load %arg5[%c0_14, %c0_15] : memref<8x128xf32, #tpu.memory_space<vmem>>, vector<8x128xf32>
      %40 = vector.shape_cast %38 : vector<16x128xf32> to vector<2x8x128xf32>
      %cst_16 = arith.constant dense<0.000000e+00> : vector<8x128xf32>
      %41 = vector.multi_reduction <add>, %40, %cst_16 [0] : vector<2x8x128xf32> to vector<8x128xf32>
      %42 = arith.addf %39, %41 : vector<8x128xf32>
      %c0_17 = arith.constant 0 : index
      %c0_18 = arith.constant 0 : index
      %43 = vector.load %arg5[%c0_17, %c0_18] : memref<8x128xf32, #tpu.memory_space<vmem>>, vector<8x128xf32>
      tpu.vector_store %arg5[%c0_17, %c0_18], %42 {strides = array<i32>} : memref<8x128xf32, #tpu.memory_space<vmem>>, vector<8x128xf32>,
    } else {
    }
    %c0_i32_3 = arith.constant 0 : i32
    %8 = arith.cmpi eq, %arg1, %c0_i32_3 : i32
    %9 = arith.extui %8 : i1 to i32
    %c0_i32_4 = arith.constant 0 : i32
    %10 = arith.cmpi ne, %9, %c0_i32_4 : i32
    scf.if %10 {
      %c0 = arith.constant 0 : index
      %c0_5 = arith.constant 0 : index
      %11 = vector.load %arg5[%c0, %c0_5] : memref<8x128xf32, #tpu.memory_space<vmem>>, vector<8x128xf32>
      %c0_6 = arith.constant 0 : index
      %c0_7 = arith.constant 0 : index
      %12 = vector.load %arg4[%c0_6, %c0_7] : memref<8x128xf32, #tpu.memory_space<vmem>>, vector<8x128xf32>
      tpu.vector_store %arg4[%c0_6, %c0_7], %11 {strides = array<i32>} : memref<8x128xf32, #tpu.memory_space<vmem>>, vector<8x128xf32>,
    } else {
    }
    return
  }
  func.func @transform_0(%arg0: i32, %arg1: i32) -> (i32, i32) {
    %c1_i32 = arith.constant 1 : i32
    %0 = arith.muli %arg0, %c1_i32 : i32
    %1 = arith.addi %0, %arg1 : i32
    %c0_i32 = arith.constant 0 : i32
    %2 = arith.minsi %1, %c0_i32 : i32
    %c0_i32_0 = arith.constant 0 : i32
    %c0_i32_1 = arith.constant 0 : i32
    return %2, %c0_i32_0 : i32, i32
  }
  func.func @transform_1(%arg0: i32, %arg1: i32) -> (i32, i32) {
    %c1_i32 = arith.constant 1 : i32
    %0 = arith.muli %arg0, %c1_i32 : i32
    %1 = arith.addi %0, %arg1 : i32
    %c0_i32 = arith.constant 0 : i32
    %2 = arith.minsi %1, %c0_i32 : i32
    %c0_i32_0 = arith.constant 0 : i32
    %c0_i32_1 = arith.constant 0 : i32
    return %2, %c0_i32_0 : i32, i32
  }
  func.func @transform_2(%arg0: i32, %arg1: i32) -> (i32, i32) {
    %c0_i32 = arith.constant 0 : i32
    %c0_i32_0 = arith.constant 0 : i32
    return %arg0, %c0_i32 : i32, i32
  }
}

</mosaic_0001>

<bundles_post_ra>
// kernel: tpu_custom_call.1
= control target key start
LH: loop header
LB: loop body
LE: loop exit
PB: predicated region body
PF: predicated region fallthrough
CT: control target
= control target key end

     0   :  { %7 = vsyncpa [#allocation4], 0  ;;  %s940_s0 = inlined_call_operand.hbm [shape: f32[16,128], index: 0, kind: input, shape index: {}]   ;;  %s941_s1 = inlined_call_operand.hbm [shape: f32[16,128], index: 1, kind: input, shape index: {}]   ;;  %s942_s2 = inlined_call_operand.hbm [shape: f32[16,128], index: 2, kind: output, shape index: {}]  }
   0x1   :  { %9 = vsyncpa [#allocation4 + $0x1], 0 }
   0x2   :  { %10 = vsyncpa [#allocation7], 0 }
   0x3   :  { %12 = vsyncpa [#allocation7 + $0x1], 0 }
   0x4   :  { %13 = vsyncpa [#allocation5], 0 }
   0x5   :  { %15 = vsyncpa [#allocation5 + $0x1], 0  ;;  %s756_s9 = smov 0   ;;  %s758_s10 = smov 0  }
   0x6   :  { %s760_s11 = smov 0   ;;  %s762_s12 = smov 0  }
   0x7   :  { %s764_s13 = smov 0   ;;  %s766_s14 = smov 0  }
   0x8   :  { %s768_s15 = smov 0   ;;  %s770_s16 = smov 0  }
   0x9 LB: > { %s440_s17 = sadd.s32 4294967295, %s734_s16   ;;  %s441_s18 = sadd.s32 4294967294, %s734_s16   ;;  %s734_s16 = sphi %s770_s16, %s21_s16   ;;  %s730_s15 = sphi %s768_s15, %s954_s15   ;;  %s726_s14 = sphi %s766_s14, %s953_s14   ;;  %s722_s13 = sphi %s764_s13, %s930_s13   ;;  %s718_s12 = sphi %s762_s12, %s952_s12   ;;  %s714_s11 = sphi %s760_s11, %s951_s11   ;;  %s710_s10 = sphi %s758_s10, %s950_s10   ;;  %s706_s9 = sphi %s756_s9, %s949_s9  }
   0xa   : > { %s33_s19 = sadd.s32 1, %s730_s15  ;;  %p703_p1 = scmp.ne.s32.totalorder %s722_s13, 0 }
   0xb   : > { %p35_p0 = scmp.ge.s32.totalorder %s33_s19, 2  ;;  %p54_p2 = scmp.eq.s32.totalorder %s734_s16, 0 }
   0xc   : > { %p59_p3 = scmp.ne.s32.totalorder %s722_s13, %s718_s12  ;;  %p60_p5 = scmp.eq.s32.totalorder %s440_s17, 0 }
   0xd   : > { %s956_s19 = smov (%p35_p0, %s33_s19), 0  ;;  %p802_p4 = por %p703_p1, %p54_p2 }
   0xe   : > { %p806_p6 = por %p60_p5, %p59_p3  ;;  %s101_s22 = ssub.s32 %s730_s15, %s956_s19 }
   0xf   : > { %p102_p7 = scmp.eq.s32.totalorder %s101_s22, 0  ;;  %s104_s23 = sadd.s32 1, %s714_s11 }
  0x10   : > { %p114_p8 = scmp.ne.s32.totalorder %s714_s11, %s710_s10  ;;  %p115_p9 = scmp.eq.s32.totalorder %s440_s17, 1 }
  0x11   : > { %s814_s24 = scalar_select %p102_p7, %s714_s11, %s104_s23  }
  0x12   : > { %p120_p10 = scmp.ne.s32.totalorder %s710_s10, %s706_s9  ;;  %p121_p11 = scmp.eq.s32.totalorder %s441_s18, 1 }
  0x13   : > { %p820_p12 = por %p115_p9, %p114_p8  ;;  %p443_p13 = scmp.ge.s32.totalorder %s734_s16, 2 }
  0x14   : > { %p825_p0 = por %p121_p11, %p120_p10  ;;  %p478_p1 = scmp.lt.s32.totalorder %s734_s16, 2 }
  0x15   : > { %s154_s29 = sshll.u32 %s940_s0, 4  ;;  %s736_s30 = smov [#allocation3]   ;;  %s155_s29 = int_to_ptr.hbm [resolvable:$true] %s154_s29 }
  0x16   : > { %s156_s3 = sshll.u32 %s736_s30, 4  ;;  %p835_p2 = pnand %p478_p1, %p802_p4  ;;  %s157_s3 = int_to_ptr.vmem [resolvable:$true] %s156_s3 }
  0x17   : > { %p450_p3 = scmp.ge.s32.totalorder %s734_s16, 1  ;;  %p189_p5 = scmp.lt.s32.totalorder %s734_s16, 3 }
  0x18   : > { %s567_s5 = sshra.s32 %s155_s29, 4  ;;  %p571_p8 = pneg %p835_p2  ;;  %s568_s5 = int_to_ptr.hbm [resolvable:$true] %s567_s5 }
  0x19   : > { %s569_s6 = scalar_lea.hbm %s568_s5, 16  ;;  %s574_s12 = scalar_lea.hbm %s940_s0, 16 }
  0x1a   : > { %p570_p7 = scmp.ne.s32.totalorder %s568_s5, %s569_s6  ;;  %p576_p4 = scmp.lt.s32.totalorder %s574_s12, %s569_s6 }
  0x1c   : > { %p572_p9 = pnand %p571_p8, %p570_p7 }
  0x1e   : > { %p573_p10 = pneg %p572_p9 }
  0x20   : > { %p578_p11 = pnand %p576_p4, %p573_p10 }
  0x22   : > { %581 = shalt.err (!%p578_p11)
}
  0x23   : > { %s737_s17 = smov 128   ;;  %s738_s18 = smov 8  }
  0x24   : > { %470 = dma.hbm_to_vmem [thread:$0]  (!%p835_p2), %s155_s29, 256, %s157_s3, [#allocation4], %s737_s17, %s737_s17, %s738_s18  }
  0x25   : > { %p855_p1 = pnand %p450_p3, %p189_p5  ;;  %s179_s27 = sshll.u32 %s941_s1, 4  ;;  %s180_s27 = int_to_ptr.hbm [resolvable:$true] %s179_s27 }
  0x26   : > { %s739_s28 = smov [#allocation6]   ;;  %s597_s5 = sshra.s32 %s180_s27, 4  ;;  %s598_s5 = int_to_ptr.hbm [resolvable:$true] %s597_s5 }
  0x27   : > { %s181_s30 = sshll.u32 %s739_s28, 4  ;;  %s599_s6 = scalar_lea.hbm %s598_s5, 16  ;;  %s182_s30 = int_to_ptr.vmem [resolvable:$true] %s181_s30 }
  0x28   : > { %p600_p7 = scmp.ne.s32.totalorder %s598_s5, %s599_s6  ;;  %s604_s7 = scalar_lea.hbm %s941_s1, 16 }
  0x29   : > { %p606_p3 = scmp.lt.s32.totalorder %s604_s7, %s599_s6 }
  0x2a   : > { %p602_p9 = pnand %p600_p7, %p571_p8 }
  0x2c   : > { %p603_p10 = pneg %p602_p9 }
  0x2e   : > { %p608_p5 = pnand %p606_p3, %p603_p10 }
  0x30   : > { %611 = shalt.err (!%p608_p5)
}
  0x31   : > { %473 = dma.hbm_to_vmem [thread:$0]  (!%p835_p2), %s180_s27, 256, %s182_s30, [#allocation7], %s737_s17, %s737_s17, %s738_s18  }
  0x32   : > { %193 = sbr.rel (%p855_p1) target bundleno = 122 (0x7a), region = 28  ;;  %s195_s8 = sand.u32 (!%p855_p1), 1, %s722_s13  }
  0x33   : > { %s451_s12 = sshll.u32 (!%p855_p1), %s195_s8, 4  ;;  %s196_s22 = scalar_lea.sflag (!%p855_p1), [#allocation4], %s195_s8 }
  0x34   : > { %s199_s23 = scalar_lea.vmem (!%p855_p1), [#allocation3], %s451_s12 }
  0x37   : > { %692 = dma.done.wait (%p806_p6), %s196_s22, 256  }
  0x38   : > { %694 = vsyncadd (%p806_p6), %s196_s22, 4294967040  ;;  %s206_s28 = scalar_lea.sflag [#allocation7], %s195_s8  ;;  %s877_s5 = scalar_lea.vmem [#allocation6], %s451_s12 }
  0x39   : > { %696 = dma.done.wait (%p806_p6), %s206_s28, 256  }
  0x3a   : > { %698 = vsyncadd (%p806_p6), %s206_s28, 4294967040  ;;  %s233_s4 = sand.u32 1, %s710_s10   ;;  %v740_v0 = vmov 0.0   ;;  %p454_p2 = scmp.ge.s32.totalorder %s726_s14, 1 }
  0x3b   : > { %s886_s17 = sshll.u32 %s233_s4, 3  ;;  %249 = vst [vmem:[#allocation2] sm:$0xff] %v740_v0 }
  0x3c   : > { %s235_s18 = scalar_lea.vmem [#allocation8], %s886_s17  ;;  %253 = sbr.rel (%p454_p2) target bundleno = 107 (0x6b), region = 44 }
  0x41   : > { %v254_v1 = vld [vmem:[%s199_s23] sm:$0xff]  ;;  %v255_v2 = vld [vmem:[%s199_s23 + $0x8] sm:$0xff] }
  0x42   : > { %v258_v3 = vand.u32 2147483647, %v254_v1  ;;  %v259_v4 = vand.u32 2147483647, %v255_v2  ;;  %v256_v15 = vld [vmem:[%s877_s5] sm:$0xff]  ;;  %vm296_vm0 = vcmp.ge.f32.partialorder %v254_v1, 0.0 }
  0x43   : > { %v257_v17 = vld [vmem:[%s877_s5 + $0x8] sm:$0xff]  ;;  %vm297_vm1 = vcmp.ge.f32.partialorder %v255_v2, 0.0  ;;  %v266_v22 = vmax.f32 %v254_v1, 0.0  ;;  %v267_v23 = vmax.f32 %v255_v2, 0.0  ;;  %v268_v24 = vmul.f32 %v256_v15, %v254_v1 }
  0x44   : > { %v260_v5 = vsub.f32 0.0, %v258_v3  ;;  %v261_v6 = vsub.f32 0.0, %v259_v4  ;;  %v269_v27 = vmul.f32 %v257_v17, %v255_v2  ;;  %vm306_vm4 = vcmp.gt.f32.partialorder %v256_v15, 0.0  ;;  %v314_v53 = vld [vmem:[#allocation2] sm:$0xff] }
  0x45   : > { %v270_v36 = vsub.f32 %v266_v22, %v268_v24  ;;  %vm307_vm5 = vcmp.gt.f32.partialorder %v257_v17, 0.0 }
  0x46   : > { %v262_v7 = vmul.f32 1.442695, %v260_v5  ;;  %v264_v8 = vmul.f32 1.442695, %v261_v6  ;;  %v271_v38 = vsub.f32 %v267_v23, %v269_v27 }
  0x48   : > { %555 = vpow2.f32 %v262_v7 }
  0x49   : > { %557 = vpow2.f32 %v264_v8 }
  0x4e   : > { %v556_v9 = vpop.eup %555 }
  0x4f   : > { %v558_v10 = vpop.eup %557  ;;  %v272_v11 = vadd.f32 1.0, %v556_v9  ;;  %v275_v12 = vmul.f32 -0.5, %v556_v9  ;;  %v278_v18 = vand.u32 2147483647, %v556_v9  ;;  %v298_v25 = vsel %vm296_vm0, 1.0, %v556_v9 }
  0x50   : > { %v281_v13 = vadd.f32 1.0, %v558_v10  ;;  %v284_v14 = vmul.f32 -0.5, %v558_v10  ;;  %v287_v20 = vand.u32 2147483647, %v558_v10  ;;  %v299_v30 = vsel %vm297_vm1, 1.0, %v558_v10 }
  0x51   : > { %559 = vlog2.f32 %v272_v11  ;;  %v276_v16 = vadd.f32 1.0, %v275_v12  ;;  %vm279_vm2 = vcmp.lt.f32.partialorder %v278_v18, 0.0004427343 }
  0x52   : > { %561 = vlog2.f32 %v281_v13  ;;  %v285_v19 = vadd.f32 1.0, %v284_v14  ;;  %vm288_vm3 = vcmp.lt.f32.partialorder %v287_v20, 0.0004427343 }
  0x53   : > { %563 = vrcp.f32 %v272_v11  ;;  %v277_v29 = vmul.f32 %v556_v9, %v276_v16 }
  0x54   : > { %565 = vrcp.f32 %v281_v13  ;;  %v286_v33 = vmul.f32 %v558_v10, %v285_v19 }
  0x57   : > { %v560_v21 = vpop.eup %559 }
  0x58   : > { %v562_v26 = vpop.eup %561  ;;  %v274_v28 = vmul.f32 0.6931472, %v560_v21 }
  0x59   : > { %v564_v31 = vpop.eup %563  ;;  %v283_v32 = vmul.f32 0.6931472, %v562_v26 }
  0x5a   : > { %v566_v34 = vpop.eup %565  ;;  %v300_v35 = vmul.f32 %v564_v31, %v298_v25  ;;  %v280_v39 = vsel %vm279_vm2, %v277_v29, %v274_v28 }
  0x5b   : > { %v301_v37 = vmul.f32 %v566_v34, %v299_v30  ;;  %v289_v41 = vsel %vm288_vm3, %v286_v33, %v283_v32  ;;  %v290_v44 = vadd.f32 %v280_v39, %v270_v36 }
  0x5c   : > { %v302_v40 = vsub.f32 %v300_v35, %v256_v15  ;;  %v291_v46 = vadd.f32 %v289_v41, %v271_v38 }
  0x5d   : > { %v303_v42 = vsub.f32 %v301_v37, %v257_v17 }
  0x5e   : > { %v304_v43 = vmul.f32 %v302_v40, %v302_v40 }
  0x5f   : > { %v305_v45 = vmul.f32 %v303_v42, %v303_v42 }
  0x60   : > { %v308_v47 = vmul.f32 0.25, %v304_v43 }
  0x61   : > { %v309_v48 = vmul.f32 0.25, %v305_v45 }
  0x62   : > { %v310_v49 = vsel %vm306_vm4, %v256_v15, %v308_v47 }
  0x63   : > { %v311_v50 = vsel %vm307_vm5, %v257_v17, %v309_v48  ;;  %v312_v51 = vmul.f32 %v310_v49, %v290_v44 }
  0x64   : > { %v313_v52 = vmul.f32 %v311_v50, %v291_v46 }
  0x66   : > { %v315_v54 = vadd.f32 %v313_v52, %v312_v51 }
  0x68   : > { %v316_v55 = vadd.f32 %v315_v54, %v314_v53 }
  0x6a   : > { %317 = vst [vmem:[#allocation2] sm:$0xff] %v316_v55 }
  0x6b PF: > { %s456_s21 = sshll.u32 %s726_s14, 3  ;;  %s336_s6 = sshll.u32 %s235_s18, 4  ;;  %s337_s6 = int_to_ptr.vmem [resolvable:$true] %s336_s6 }
  0x6c   : > { %s334_s30 = scalar_lea.hbm %s942_s2, %s456_s21  ;;  %s324_s3 = scalar_lea.sflag [#allocation5], %s233_s4 }
  0x6d   : > { %s338_s29 = sshll.u32 %s334_s30, 4  ;;  %s647_s22 = scalar_lea.hbm %s942_s2, 16  ;;  %s339_s29 = int_to_ptr.hbm [resolvable:$true] %s338_s29 }
  0x6e   : > { %s641_s7 = sshra.s32 %s339_s29, 4  ;;  %s642_s7 = int_to_ptr.hbm [resolvable:$true] %s641_s7 }
  0x6f   : > { %s643_s8 = scalar_lea.hbm %s642_s7, 8  ;;  %p648_p11 = scmp.lt.s32.totalorder %s642_s7, %s942_s2 }
  0x70   : > { %p644_p6 = scmp.ne.s32.totalorder %s642_s7, %s643_s8  ;;  %p649_p1 = scmp.lt.s32.totalorder %s647_s22, %s643_s8 }
  0x71   : > { %v321_v56 = vld [vmem:[#allocation2] sm:$0xff] }
  0x72   : > { %322 = vst [vmem:[%s235_s18] sm:$0xff] %v321_v56  ;;  %p645_p8 = pnand %p644_p6, %p820_p12  ;;  %p650_p7 = por %p649_p1, %p648_p11 }
  0x74   : > { %p646_p4 = pneg %p645_p8 }
  0x76   : > { %p651_p9 = pnand %p650_p7, %p646_p4 }
  0x78   : > { %654 = shalt.err (!%p651_p9)
}
  0x79   : > { %465 = dma.vmem_to_hbm [thread:$0]  (%p820_p12), %s337_s6, 128, %s339_s29, %s324_s3  }
  0x7a PF: > { %s350_s5 = sand.u32 1, %s706_s9   ;;  %p475_p10 = pnand %p443_p13, %p825_p0 }
  0x7b   : > { %s351_s4 = scalar_lea.sflag [#allocation5], %s350_s5 }
  0x7c   : > { %p476_p3 = pneg %p475_p10 }
  0x7e   : > { %700 = dma.done.wait (%p476_p3), %s351_s4, 128  }
  0x7f   : > { %702 = vsyncadd (%p476_p3), %s351_s4, 4294967168  ;;  %s21_s16 = sadd.s32 1, %s734_s16   ;;  %s949_s9 = smov %s710_s10 }
  0x80   : > { %p18_p5 = scmp.ge.s32.totalorder %s21_s16, 4   ;;  %s950_s10 = smov %s714_s11 }
  0x81   : > { %s951_s11 = smov %s814_s24  ;;  %s952_s12 = smov %s722_s13 }
  0x82   : > { %s930_s13 = smov 0   ;;  %s953_s14 = smov %s730_s15 }
  0x83   : > { %s954_s15 = smov %s956_s19  ;;  %20 = sbr.rel (!%p18_p5) target bundleno = 9 (0x9), region = 98 }
  0x88   :  { %357 = vsyncpa [#allocation4], 1 }
  0x89   :  { %359 = vsyncpa [#allocation4 + $0x1], 1 }
  0x8a   :  { %360 = vsyncpa [#allocation7], 1 }
  0x8b   :  { %362 = vsyncpa [#allocation7 + $0x1], 1 }
  0x8c   :  { %363 = vsyncpa [#allocation5], 1 }
  0x8d   :  { %365 = vsyncpa [#allocation5 + $0x1], 1 }

</bundles_post_ra>
